<compile_context>
chip_gen: v7x
topology: tpu7x:2x2x1
jax: 0.10.0
libtpu: 0.0.40
codegen_flags: <defaults>
</compile_context>

<pallas_src>
import jax
import jax.numpy as jnp
from jax import lax
from jax.experimental import pallas as pl
from jax.experimental.pallas import tpu as pltpu


def _fusion_kernel(rs_ref, ra_ref, w_ref, b_ref, o_ref):
    # rs_ref: (TM, Ds)   ra_ref: (TM, Da)
    # w_ref : (2, Ds+Da) PyTorch nn.Linear layout (resident across grid)
    # b_ref : (2, 1)     f32 (resident)
    # o_ref : (2, TM)    transposed, lane-dense output block
    ds = rs_ref.shape[-1]
    x_dtype = rs_ref.dtype

    w = w_ref[...].astype(x_dtype)      # tiny; enables bf16 MXU path if needed
    w_s = w[:, :ds]                     # (2, Ds)  -> multiplies r_s
    w_a = w[:, ds:]                     # (2, Da)  -> multiplies r_a

    # out^T = W_s @ r_s^T + W_a @ r_a^T   (contract both dim-1's on the MXU)
    acc = lax.dot_general(
        w_s, rs_ref[...],
        dimension_numbers=(((1,), (1,)), ((), ())),
        preferred_element_type=jnp.float32)
    acc = acc + lax.dot_general(
        w_a, ra_ref[...],
        dimension_numbers=(((1,), (1,)), ((), ())),
        preferred_element_type=jnp.float32)
    acc = acc + b_ref[...]              # (2, 1) bias broadcast over lanes
    o_ref[...] = jax.nn.sigmoid(acc).astype(o_ref.dtype)


def _round_up(x, m):
    return ((x + m - 1) // m) * m


def _cdiv(a, b):
    return -(-a // b)


def concat_fusion_forward(r_a, r_s, weight, bias, *, block_rows=8192):
    """Pallas implementation of ConcatFusionBlock.forward.

    Args:
      r_a:    (N, Da) acoustic representations (f32 or bf16)
      r_s:    (N, Ds) semantic representations (f32 or bf16)
      weight: (2, Ds + Da) nn.Linear weight acting on concat([r_s, r_a])
      bias:   (2,)
      block_rows: max row-tile size (rounded up to a multiple of 128)
    Returns:
      (N, 2) float32
    """
    n, da = r_a.shape
    n_s, ds = r_s.shape
    assert n_s == n
    assert weight.shape == (2, ds + da)
    assert bias.shape == (2,)

    if n == 0:
        return jnp.zeros((0, 2), jnp.float32)

    block_rows = max(128, _round_up(block_rows, 128))
    if n < 128:
        # Single full-extent block (full-array exception to the (8,128) rule).
        tm = n
    else:
        # Aim for >=4 grid steps when N allows (v7x megacore + pipeline
        # overlap), capped by block_rows; tm stays a multiple of 128 so the
        # transposed output blocks stay lane-dense.
        tm = min(block_rows, max(128, _round_up(_cdiv(n, 4), 128)))
    grid = (_cdiv(n, tm),)

    b2 = bias.reshape(2, 1).astype(jnp.float32)

    itemsize = jnp.dtype(r_s.dtype).itemsize
    cost = pl.CostEstimate(
        flops=4 * n * (ds + da),
        transcendentals=2 * n,
        bytes_accessed=(n * (ds + da) * itemsize      # r_s + r_a reads
                        + 2 * (ds + da) * 4 + 2 * 4   # weight + bias
                        + 2 * n * 4),                 # (2, N) output
    )

    out_t = pl.pallas_call(
        _fusion_kernel,
        out_shape=jax.ShapeDtypeStruct((2, n), jnp.float32),
        grid_spec=pltpu.PrefetchScalarGridSpec(
            num_scalar_prefetch=0,
            grid=grid,
            in_specs=[
                pl.BlockSpec((tm, ds), lambda i: (i, 0)),       # r_s rows
                pl.BlockSpec((tm, da), lambda i: (i, 0)),       # r_a rows
                pl.BlockSpec((2, ds + da), lambda i: (0, 0)),   # weight (resident)
                pl.BlockSpec((2, 1), lambda i: (0, 0)),         # bias   (resident)
            ],
            out_specs=pl.BlockSpec((2, tm), lambda i: (0, i)),  # lane-dense slab
        ),
        compiler_params=pltpu.CompilerParams(
            dimension_semantics=("parallel",),       # megacore on v7x
            vmem_limit_bytes=32 * 1024 * 1024,       # lane-padded big tiles > v5e's 16 MiB default
        ),
        cost_estimate=cost,
    )(r_s, r_a, weight, b2)

    # Layout plumbing only: (2, N) -> (N, 2).  Call this wrapper from inside
    # the consumer's jit so XLA fuses the transpose (or consume out_t
    # directly if a (2, N) layout is acceptable downstream).
    return out_t.T


def concat_fusion_ref(r_a, r_s, weight, bias):
    """Pure-JAX reference matching the PyTorch forward exactly."""
    r_sa = jnp.concatenate([r_s, r_a], axis=-1)
    return jax.nn.sigmoid(r_sa.astype(jnp.float32) @ weight.T.astype(jnp.float32)
                          + bias.astype(jnp.float32))


# TODO(synk): get_loss (nn.CrossEntropyLoss) is training-only and not part of
# the forward pass; it is intentionally not implemented as a kernel.

if __name__ == "__main__":
    # Small, deterministic example consistent with the module:
    # acoustic_dim = 32, semantic_dim = 32, batch N = 8.
    N, Da, Ds = 8, 32, 32

    key = jax.random.PRNGKey(0)
    k_ra, k_rs, k_w, k_b, k_ra2, k_rs2 = jax.random.split(key, 6)

    r_a = jax.random.normal(k_ra, (N, Da), dtype=jnp.float32)
    r_s = jax.random.normal(k_rs, (N, Ds), dtype=jnp.float32)

    # Deterministic parameter init for fc_y = nn.Linear(Da + Ds, 2).
    fan_in = Da + Ds
    bound = 1.0 / jnp.sqrt(fan_in)
    weight = jax.random.uniform(k_w, (2, fan_in), minval=-bound, maxval=bound,
                                dtype=jnp.float32)
    bias = jax.random.uniform(k_b, (2,), minval=-bound, maxval=bound,
                              dtype=jnp.float32)

    y = concat_fusion_forward(r_a, r_s, weight, bias)
    jax.block_until_ready(y)
    y_ref = concat_fusion_ref(r_a, r_s, weight, bias)
    assert y.shape == (N, 2)
    assert jnp.allclose(y, y_ref, atol=1e-5, rtol=1e-5), "mismatch vs reference"

    # Exercise multi-block grid + ragged tail (N not a multiple of the tile),
    # now handled by Pallas edge-block masking (no wrapper-side padding).
    N2 = 300
    r_a2 = jax.random.normal(k_ra2, (N2, Da), dtype=jnp.float32)
    r_s2 = jax.random.normal(k_rs2, (N2, Ds), dtype=jnp.float32)
    y2 = concat_fusion_forward(r_a2, r_s2, weight, bias, block_rows=128)
    jax.block_until_ready(y2)
    y2_ref = concat_fusion_ref(r_a2, r_s2, weight, bias)
    assert y2.shape == (N2, 2)
    assert jnp.allclose(y2, y2_ref, atol=1e-5, rtol=1e-5), "mismatch (ragged N)"

    # Default (large-tile) path with the tile auto-split into ~4 grid steps.
    N3 = 1000
    r_a3 = jax.random.normal(k_ra2, (N3, Da), dtype=jnp.float32)
    r_s3 = jax.random.normal(k_rs2, (N3, Ds), dtype=jnp.float32)
    y3 = concat_fusion_forward(r_a3, r_s3, weight, bias)
    jax.block_until_ready(y3)
    y3_ref = concat_fusion_ref(r_a3, r_s3, weight, bias)
    assert y3.shape == (N3, 2)
    assert jnp.allclose(y3, y3_ref, atol=1e-5, rtol=1e-5), "mismatch (default tile)"

    print("KERNEL_OK")
</pallas_src>

<mosaic_0001>
module attributes {stable_mosaic.version = 11 : i64} {
  func.func @_fusion_kernel(%arg0: i32, %arg1: memref<8x32xf32, #tpu.memory_space<vmem>>, %arg2: memref<8x32xf32, #tpu.memory_space<vmem>>, %arg3: memref<2x64xf32, #tpu.memory_space<vmem>>, %arg4: memref<2x1xf32, #tpu.memory_space<vmem>>, %arg5: memref<2x8xf32, #tpu.memory_space<vmem>>) attributes {dimension_semantics = [#tpu.dimension_semantics<parallel>], iteration_bounds = array<i64: 1>, scalar_prefetch = 0 : i64, scratch_operands = 0 : i64, tpu.core_type = #tpu.core_type<tc>, window_params = [{transform_indices = @transform_0, window_bounds = array<i64: 8, 32>}, {transform_indices = @transform_1, window_bounds = array<i64: 8, 32>}, {pipeline_mode = #tpu.pipeline_mode<synchronous>, transform_indices = @transform_2, window_bounds = array<i64: 2, 64>}, {pipeline_mode = #tpu.pipeline_mode<synchronous>, transform_indices = @transform_3, window_bounds = array<i64: 2, 1>}, {transform_indices = @transform_4, window_bounds = array<i64: 2, 8>}]} {
    %c0 = arith.constant 0 : index
    %c0_0 = arith.constant 0 : index
    %0 = vector.load %arg3[%c0, %c0_0] : memref<2x64xf32, #tpu.memory_space<vmem>>, vector<2x64xf32>
    %1 = vector.extract_strided_slice %0 {offsets = [0, 0], sizes = [2, 32], strides = [1, 1]} : vector<2x64xf32> to vector<2x32xf32>
    %2 = vector.extract_strided_slice %0 {offsets = [0, 32], sizes = [2, 32], strides = [1, 1]} : vector<2x64xf32> to vector<2x32xf32>
    %c0_1 = arith.constant 0 : index
    %c0_2 = arith.constant 0 : index
    %3 = vector.load %arg1[%c0_1, %c0_2] : memref<8x32xf32, #tpu.memory_space<vmem>>, vector<8x32xf32>
    %cst = arith.constant dense<0.000000e+00> : vector<2x8xf32>
    %4 = tpu.matmul %1, %3, %cst {dimension_numbers = #tpu.dot_dimension_numbers<[1], [1], [0], [0], [0, 0, 1, 0], [], []>} : vector<2x32xf32>, vector<8x32xf32>, vector<2x8xf32> -> vector<2x8xf32>
    %c0_3 = arith.constant 0 : index
    %c0_4 = arith.constant 0 : index
    %5 = vector.load %arg2[%c0_3, %c0_4] : memref<8x32xf32, #tpu.memory_space<vmem>>, vector<8x32xf32>
    %cst_5 = arith.constant dense<0.000000e+00> : vector<2x8xf32>
    %6 = tpu.matmul %2, %5, %cst_5 {dimension_numbers = #tpu.dot_dimension_numbers<[1], [1], [0], [0], [0, 0, 1, 0], [], []>} : vector<2x32xf32>, vector<8x32xf32>, vector<2x8xf32> -> vector<2x8xf32>
    %7 = arith.addf %4, %6 : vector<2x8xf32>
    %c0_6 = arith.constant 0 : index
    %c0_7 = arith.constant 0 : index
    %8 = vector.load %arg4[%c0_6, %c0_7] : memref<2x1xf32, #tpu.memory_space<vmem>>, vector<2x1xf32>
    %9 = vector.broadcast %8 : vector<2x1xf32> to vector<2x8xf32>
    %10 = arith.addf %7, %9 : vector<2x8xf32>
    %11 = arith.negf %10 : vector<2x8xf32>
    %12 = math.exp %11 : vector<2x8xf32>
    %cst_8 = arith.constant 1.000000e+00 : f32
    %13 = vector.broadcast %cst_8 : f32 to vector<2x8xf32>
    %14 = arith.addf %13, %12 : vector<2x8xf32>
    %15 = arith.divf %13, %14 : vector<2x8xf32>
    %c0_9 = arith.constant 0 : index
    %c0_10 = arith.constant 0 : index
    %16 = vector.load %arg5[%c0_9, %c0_10] : memref<2x8xf32, #tpu.memory_space<vmem>>, vector<2x8xf32>
    tpu.vector_store %arg5[%c0_9, %c0_10], %15 {strides = array<i32>} : memref<2x8xf32, #tpu.memory_space<vmem>>, vector<2x8xf32>,
    return
  }
  func.func @transform_0(%arg0: i32) -> (i32, i32) {
    %c0_i32 = arith.constant 0 : i32
    %c0_i32_0 = arith.constant 0 : i32
    return %arg0, %c0_i32 : i32, i32
  }
  func.func @transform_1(%arg0: i32) -> (i32, i32) {
    %c0_i32 = arith.constant 0 : i32
    %c0_i32_0 = arith.constant 0 : i32
    return %arg0, %c0_i32 : i32, i32
  }
  func.func @transform_2(%arg0: i32) -> (i32, i32) {
    %c0_i32 = arith.constant 0 : i32
    %c0_i32_0 = arith.constant 0 : i32
    %c0_i32_1 = arith.constant 0 : i32
    return %c0_i32, %c0_i32_0 : i32, i32
  }
  func.func @transform_3(%arg0: i32) -> (i32, i32) {
    %c0_i32 = arith.constant 0 : i32
    %c0_i32_0 = arith.constant 0 : i32
    %c0_i32_1 = arith.constant 0 : i32
    return %c0_i32, %c0_i32_0 : i32, i32
  }
  func.func @transform_4(%arg0: i32) -> (i32, i32) {
    %c0_i32 = arith.constant 0 : i32
    %c0_i32_0 = arith.constant 0 : i32
    return %c0_i32, %arg0 : i32, i32
  }
}

</mosaic_0001>

<bundles_post_ra>
// kernel: tpu_custom_call.1
= control target key start
LH: loop header
LB: loop body
LE: loop exit
PB: predicated region body
PF: predicated region fallthrough
CT: control target
= control target key end

     0   :  { %9 = vsyncpa [#allocation3], 0  ;;  %s407_s0 = inlined_call_operand.hbm [shape: f32[8,32], index: 0, kind: input, shape index: {}]   ;;  %s408_s1 = inlined_call_operand.hbm [shape: f32[8,32], index: 1, kind: input, shape index: {}]   ;;  %s409_s2 = inlined_call_operand.vmem [shape: f32[2,64], index: 2, kind: input, shape index: {}]   ;;  %s410_s3 = inlined_call_operand.vmem [shape: f32[2,1], index: 3, kind: input, shape index: {}]   ;;  %s411_s4 = inlined_call_operand.hbm [shape: f32[2,8], index: 4, kind: output, shape index: {}]  }
   0x1   :  { %10 = vsyncpa [#allocation6], 0 }
   0x2   :  { %11 = vsyncpa [#allocation4], 0  ;;  %s333_s15 = smov [#allocation2]   ;;  %s334_s17 = smov [#allocation5]  }
   0x3   :  { %s18_s16 = sshll.u32 %s333_s15, 4  ;;  %s28_s18 = sshll.u32 %s334_s17, 4  ;;  %s19_s16 = int_to_ptr.vmem [resolvable:$true] %s18_s16  ;;  %s29_s18 = int_to_ptr.vmem [resolvable:$true] %s28_s18 }
   0x4   :  { %s261_s21 = scalar_lea.hbm %s407_s0, 128 }
   0x5   :  { %p262_p0 = scmp.ne.s32.totalorder %s407_s0, %s261_s21  ;;  %p265_p1 = scmp.lt.u32.totalorder %s261_s21, %s407_s0 }
   0x7   :  { %p267_p2 = pnand %p265_p1, %p262_p0 }
   0x9   :  { %270 = shalt.err (!%p267_p2)
}
   0xa   :  { %s271_s26 = scalar_lea.vmem %s19_s16, 128  ;;  %p276_p4 = scmp.lt.s32.totalorder %s19_s16, %s19_s16 }
   0xb   :  { %p272_p3 = scmp.ne.s32.totalorder %s19_s16, %s271_s26  ;;  %p277_p5 = scmp.lt.s32.totalorder %s271_s26, %s271_s26 }
   0xd   :  { %p278_p6 = por %p277_p5, %p276_p4 }
   0xf   :  { %p279_p7 = pnand %p278_p6, %p272_p3 }
  0x11   :  { %282 = shalt.err (!%p279_p7)
}
  0x12   :  { %21 = dma.hbm_to_vmem [thread:$0]  %s407_s0, 128, %s19_s16, [#allocation3]  }
  0x13   :  { %s283_s5 = scalar_lea.hbm %s408_s1, 128 }
  0x14   :  { %p284_p8 = scmp.ne.s32.totalorder %s408_s1, %s283_s5  ;;  %p287_p9 = scmp.lt.u32.totalorder %s283_s5, %s408_s1 }
  0x16   :  { %p289_p10 = pnand %p287_p9, %p284_p8 }
  0x18   :  { %292 = shalt.err (!%p289_p10)
}
  0x19   :  { %s293_s10 = scalar_lea.vmem %s29_s18, 128  ;;  %p298_p12 = scmp.lt.s32.totalorder %s29_s18, %s29_s18 }
  0x1a   :  { %p294_p11 = scmp.ne.s32.totalorder %s29_s18, %s293_s10  ;;  %p299_p13 = scmp.lt.s32.totalorder %s293_s10, %s293_s10 }
  0x1c   :  { %p300_p0 = por %p299_p13, %p298_p12 }
  0x1e   :  { %p301_p1 = pnand %p300_p0, %p294_p11 }
  0x20   :  { %304 = shalt.err (!%p301_p1)
}
  0x21   :  { %31 = dma.hbm_to_vmem [thread:$0]  %s408_s1, 128, %s29_s18, [#allocation6]  }
  0x22   :  { %327 = dma.done.wait [#allocation3], 128  }
  0x23   :  { %328 = vsyncadd [#allocation3], 4294967168 }
  0x24   :  { %329 = dma.done.wait [#allocation6], 128  }
  0x25   :  { %330 = vsyncadd [#allocation6], 4294967168  ;;  %v335_v0 = vmov 0.0   ;;  %vm336_vm0 = vmmov 0   ;;  %v337_v1 = vmov 0   ;;  %vm48_vm1 = vcmask 261120  }
  0x26   :  { %244 = vmatprep.subr.mxu1 %v335_v0  ;;  %239 = vmatprep.subr.mxu0 %v335_v0  ;;  %v42_v2 = vld [vmem:[%s409_s2] sm:$0x3]  ;;  %v44_v4 = vld [vmem:[#allocation5] sm:$0xff]  ;;  %s338_s1 = smov 96   ;;  %s339_s2 = smov [#allocation7]   ;;  %vm212_vm2 = vcmask 58368  }
  0x27   :  { %246 = vmatprep.mubr.msk.f32.mxu1 %vm336_vm0, %v335_v0  ;;  %241 = vmatprep.mubr.msk.f32.mxu0 %vm336_vm0, %v335_v0  ;;  %v43_v3 = vld [vmem:[#allocation2] sm:$0xff]  ;;  %s220_s16 = sshll.u32 %s339_s2, 4  ;;  %s221_s16 = int_to_ptr.vmem [resolvable:$true] %s220_s16 }
  0x28   :  { %256 = vset.pattern.permute.xlu0 %v337_v1  ;;  %245 = vmatpush3.xpose.msk.msra.mxu1 %vm48_vm1, %v43_v3  ;;  %v199_v5 = vld [vmem:[%s410_s3] sm:$0x3]  ;;  %s305_s3 = scalar_lea.vmem %s221_s16, 32  ;;  %p310_p3 = scmp.lt.s32.totalorder %s221_s16, %s221_s16 }
  0x29   :  { %46 = vrot.lane.b32.xlu0 %v42_v2, %s338_s1  ;;  %240 = vmatpush3.xpose.msk.msra.mxu0 %vm48_vm1, %v44_v4  ;;  %p306_p2 = scmp.ne.s32.totalorder %s221_s16, %s305_s3  ;;  %p311_p4 = scmp.lt.s32.totalorder %s305_s3, %s305_s3 }
  0x2b   :  { %247 = vmatmul.mubr.msk.f32.vlgmr.msra.gmra.mrb[0].mxu1 %vm48_vm1, %v42_v2  ;;  %p312_p5 = por %p311_p4, %p310_p3 }
  0x2d   :  { %202 = vperm.xlu0 %256, %v199_v5   ;;  %p313_p6 = pnand %p312_p5, %p306_p2 }
  0x9b   :  { %v47_v6 = vpop.permute.xlu0 %46 }
  0x9c   :  { %242 = vmatmul.mubr.msk.f32.vlgmr.msra.gmra.mrb[0].mxu0 %vm48_vm1, %v47_v6 }
  0xac   :  { %v203_v10 = vpop.permute.xlu0 %202 }
  0xfe   :  { %v195_v7 = vpop.f32.mrb[0].mxu1 }
  0xff   :  { %v248_v8 = vpop.f32.mrb[1].mxu1 }
 0x16f   :  { %v120_v9 = vpop.f32.mrb[0].mxu0 }
 0x170   :  { %v196_v11 = vadd.f32 %v195_v7, %v120_v9  ;;  %v243_v12 = vpop.f32.mrb[1].mxu0 }
 0x172   :  { %v205_v13 = vadd.f32 %v203_v10, %v196_v11 }
 0x174   :  { %v234_v14 = vmul.f32 -1.442695, %v205_v13 }
 0x176   :  { %257 = vpow2.f32 %v234_v14 }
 0x180   :  { %v258_v15 = vpop.eup %257 }
 0x181   :  { %v209_v16 = vadd.f32 1.0, %v258_v15 }
 0x183   :  { %259 = vrcp.f32 %v209_v16 }
 0x18d   :  { %v260_v17 = vpop.eup %259 }
 0x18e   :  { %213 = vst.msk [vmem:[#allocation7] sm:$0x3] %vm212_vm2, %v260_v17 }
 0x18f   :  { %316 = shalt.err (!%p313_p6)
}
 0x190   :  { %s317_s19 = scalar_lea.hbm %s411_s4, 32 }
 0x191   :  { %p318_p7 = scmp.ne.s32.totalorder %s411_s4, %s317_s19  ;;  %p321_p8 = scmp.lt.u32.totalorder %s317_s19, %s411_s4 }
 0x193   :  { %p323_p9 = pnand %p321_p8, %p318_p7 }
 0x195   :  { %326 = shalt.err (!%p323_p9)
}
 0x196   :  { %223 = dma.vmem_to_hbm [thread:$0]  %s221_s16, 32, %s411_s4, [#allocation4]  }
 0x197   :  { %331 = dma.done.wait [#allocation4], 32  }
 0x198   :  { %332 = vsyncadd [#allocation4], 4294967264 }
 0x199   :  { %227 = vsyncpa [#allocation3], 1 }
 0x19a   :  { %228 = vsyncpa [#allocation6], 1 }
 0x19b   :  { %229 = vsyncpa [#allocation4], 1 }

</bundles_post_ra>
